<compile_context>
chip_gen: v5e
topology: v5e:2x2
jax: 0.10.0
libtpu: 0.0.40
codegen_flags: <defaults>
</compile_context>

<pallas_src>
import functools

import jax
import jax.numpy as jnp
from jax.experimental import pallas as pl
from jax.experimental.pallas import tpu as pltpu


def _linear_kernel(x_ref, w_ref, b_ref, o_ref):
    """(tb, in) x (in, out) + (1, out) -> (tb, out). Eval path (dropout = identity)."""
    y = jnp.dot(x_ref[...], w_ref[...], preferred_element_type=jnp.float32)
    o_ref[...] = (y + b_ref[...].astype(jnp.float32)).astype(o_ref.dtype)


def _dropout_linear_kernel(x_ref, bits_ref, w_ref, b_ref, o_ref, *,
                           keep_threshold: int, inv_keep: float):
    """Training path: integer-threshold dropout mask, scale folded into the epilogue."""
    # P(drop) = keep_threshold / 2^32 ~= dropout_rate; keep iff bits >= threshold.
    keep = bits_ref[...] >= jnp.uint32(keep_threshold)
    x = jnp.where(keep, x_ref[...], jnp.zeros_like(x_ref))
    y = jnp.dot(x, w_ref[...], preferred_element_type=jnp.float32)
    # (mask*x) @ W * s == (mask*x*s) @ W, so scale the smaller [tb, out] tile.
    y = y * jnp.float32(inv_keep) + b_ref[...].astype(jnp.float32)
    o_ref[...] = y.astype(o_ref.dtype)


def classifier_forward(x, weight_t, bias, *, dropout_rate: float = 0.0,
                       training: bool = False, rng_key=None, block_b: int = 128):
    """x: [B, in_f]; weight_t: [in_f, out_f] (pre-transposed once at init); bias: [out_f]."""
    B, in_f = x.shape
    in_f2, out_f = weight_t.shape
    assert in_f == in_f2 and bias.shape == (out_f,)

    # ---- one-time layout plumbing (in a real model do this at init, not per call) ----
    # Pad the output feature dim to a multiple of 128 for lane-dense (unmasked) stores.
    out_f_pad = ((out_f + 127) // 128) * 128
    if out_f_pad != out_f:
        weight_t = jnp.pad(weight_t, ((0, 0), (0, out_f_pad - out_f)))
        bias = jnp.pad(bias, (0, out_f_pad - out_f))
    b2d = bias.reshape(1, out_f_pad)

    # ---- batch tiling: big sublane-aligned tiles, pad the batch if needed ----
    block_b = min(int(block_b), B)
    block_b = ((block_b + 7) // 8) * 8          # sublane (8) aligned
    b_pad = ((B + block_b - 1) // block_b) * block_b
    x_p = jnp.pad(x, ((0, b_pad - B), (0, 0))) if b_pad != B else x
    grid = (b_pad // block_b,)

    use_dropout = training and float(dropout_rate) > 0.0

    in_specs = [pl.BlockSpec((block_b, in_f), lambda i: (i, 0))]
    args = [x_p]

    if use_dropout:
        if rng_key is None:
            rng_key = jax.random.PRNGKey(0)
        # TODO(synk): mask bits come from jax.random (host-side stream), so they cannot
        # bit-match torch's RNG; only nn.Dropout's distribution/scaling is reproduced.
        bits = jax.random.bits(rng_key, (b_pad, in_f), dtype=jnp.uint32)
        in_specs.append(pl.BlockSpec((block_b, in_f), lambda i: (i, 0)))
        args.append(bits)
        keep_threshold = min(int(round(float(dropout_rate) * 2.0 ** 32)), 2 ** 32 - 1)
        kernel = functools.partial(_dropout_linear_kernel,
                                   keep_threshold=keep_threshold,
                                   inv_keep=1.0 / (1.0 - float(dropout_rate)))
    else:
        kernel = _linear_kernel

    # Weight/bias index_maps are constant across the grid -> single-buffer them so
    # only one copy of the (potentially large) weight is resident in VMEM.
    in_specs += [
        pl.BlockSpec((in_f, out_f_pad), lambda i: (0, 0),
                     pipeline_mode=pl.Buffered(1)),
        pl.BlockSpec((1, out_f_pad), lambda i: (0, 0),
                     pipeline_mode=pl.Buffered(1)),
    ]
    args += [weight_t, b2d]

    out = pl.pallas_call(
        kernel,
        out_shape=jax.ShapeDtypeStruct((b_pad, out_f_pad), x.dtype),
        grid_spec=pltpu.PrefetchScalarGridSpec(
            num_scalar_prefetch=0,
            grid=grid,
            in_specs=in_specs,
            out_specs=pl.BlockSpec((block_b, out_f_pad), lambda i: (i, 0)),
        ),
        compiler_params=pltpu.CompilerParams(
            # Batch blocks are independent -> shard across TensorCores on v7x.
            dimension_semantics=("parallel",),
            # Fits comfortably on v5e/v6e (128 MiB) and v7x (64 MiB physical).
            vmem_limit_bytes=32 * 1024 * 1024,
        ),
    )(*args)

    return out[:B, :out_f]


if __name__ == "__main__":
    # Small, TPU-tile-friendly shapes: batch=8, in_features=256, out_features=128.
    B, IN_F, OUT_F = 8, 256, 128
    DROPOUT_RATE = 0.2  # only used when training=True

    key = jax.random.PRNGKey(0)
    kx, kw, kb, kd = jax.random.split(key, 4)
    x = jax.random.normal(kx, (B, IN_F), dtype=jnp.float32)
    # Deterministic "Linear" parameter init (Kaiming-uniform-like bound, as in nn.Linear).
    bound = 1.0 / (IN_F ** 0.5)
    weight = jax.random.uniform(kw, (OUT_F, IN_F), minval=-bound, maxval=bound,
                                dtype=jnp.float32)
    bias = jax.random.uniform(kb, (OUT_F,), minval=-bound, maxval=bound,
                              dtype=jnp.float32)

    # One-time "init": store the weight pre-transposed ([in_f, out_f]) so there is no
    # per-call HBM transpose in the steady-state forward path.
    weight_t = jnp.asarray(weight.T)

    # Inference path (dropout is identity in eval mode, matching nn.Dropout.eval()).
    out = classifier_forward(x, weight_t, bias, dropout_rate=DROPOUT_RATE,
                             training=False)
    out = jax.block_until_ready(out)
    ref = x @ weight.T + bias
    assert jnp.allclose(out, ref, atol=1e-4, rtol=1e-4), "eval mismatch vs reference"

    # Training path: the kernel and the reference share the same mask bits, so this
    # checks the dropout masking + 1/(1-p) scaling exactly.
    out_tr = classifier_forward(x, weight_t, bias, dropout_rate=DROPOUT_RATE,
                                training=True, rng_key=kd)
    out_tr = jax.block_until_ready(out_tr)
    bits_ref = jax.random.bits(kd, (B, IN_F), dtype=jnp.uint32)
    thr = min(int(round(DROPOUT_RATE * 2.0 ** 32)), 2 ** 32 - 1)
    x_drop = jnp.where(bits_ref >= jnp.uint32(thr), x, 0.0)
    ref_tr = (x_drop @ weight.T) * (1.0 / (1.0 - DROPOUT_RATE)) + bias
    assert jnp.allclose(out_tr, ref_tr, atol=1e-4, rtol=1e-4), "train mismatch vs reference"

    print("KERNEL_OK")
</pallas_src>

<mosaic_0001>
module attributes {stable_mosaic.version = 11 : i64} {
  func.func @_linear_kernel(%arg0: i32, %arg1: memref<8x256xf32, #tpu.memory_space<vmem>>, %arg2: memref<256x128xf32, #tpu.memory_space<vmem>>, %arg3: memref<1x128xf32, #tpu.memory_space<vmem>>, %arg4: memref<8x128xf32, #tpu.memory_space<vmem>>) attributes {dimension_semantics = [#tpu.dimension_semantics<parallel>], iteration_bounds = array<i64: 1>, scalar_prefetch = 0 : i64, scratch_operands = 0 : i64, tpu.core_type = #tpu.core_type<tc>, window_params = [{transform_indices = @transform_0, window_bounds = array<i64: 8, 256>}, {pipeline_mode = #tpu.pipeline_mode<synchronous>, transform_indices = @transform_1, window_bounds = array<i64: 256, 128>}, {pipeline_mode = #tpu.pipeline_mode<synchronous>, transform_indices = @transform_2, window_bounds = array<i64: 1, 128>}, {transform_indices = @transform_3, window_bounds = array<i64: 8, 128>}]} {
    %c0 = arith.constant 0 : index
    %c0_0 = arith.constant 0 : index
    %0 = vector.load %arg1[%c0, %c0_0] : memref<8x256xf32, #tpu.memory_space<vmem>>, vector<8x256xf32>
    %c0_1 = arith.constant 0 : index
    %c0_2 = arith.constant 0 : index
    %1 = vector.load %arg2[%c0_1, %c0_2] : memref<256x128xf32, #tpu.memory_space<vmem>>, vector<256x128xf32>
    %cst = arith.constant dense<0.000000e+00> : vector<8x128xf32>
    %2 = tpu.matmul %0, %1, %cst {dimension_numbers = #tpu.dot_dimension_numbers<[1], [0], [0], [1], [0, 0, 1, 1], [], []>} : vector<8x256xf32>, vector<256x128xf32>, vector<8x128xf32> -> vector<8x128xf32>
    %c0_3 = arith.constant 0 : index
    %c0_4 = arith.constant 0 : index
    %3 = vector.load %arg3[%c0_3, %c0_4] : memref<1x128xf32, #tpu.memory_space<vmem>>, vector<1x128xf32>
    %4 = vector.broadcast %3 : vector<1x128xf32> to vector<8x128xf32>
    %5 = arith.addf %2, %4 : vector<8x128xf32>
    %c0_5 = arith.constant 0 : index
    %c0_6 = arith.constant 0 : index
    %6 = vector.load %arg4[%c0_5, %c0_6] : memref<8x128xf32, #tpu.memory_space<vmem>>, vector<8x128xf32>
    tpu.vector_store %arg4[%c0_5, %c0_6], %5 {strides = array<i32>} : memref<8x128xf32, #tpu.memory_space<vmem>>, vector<8x128xf32>,
    return
  }
  func.func @transform_0(%arg0: i32) -> (i32, i32) {
    %c0_i32 = arith.constant 0 : i32
    %c0_i32_0 = arith.constant 0 : i32
    return %arg0, %c0_i32 : i32, i32
  }
  func.func @transform_1(%arg0: i32) -> (i32, i32) {
    %c0_i32 = arith.constant 0 : i32
    %c0_i32_0 = arith.constant 0 : i32
    %c0_i32_1 = arith.constant 0 : i32
    return %c0_i32, %c0_i32_0 : i32, i32
  }
  func.func @transform_2(%arg0: i32) -> (i32, i32) {
    %c0_i32 = arith.constant 0 : i32
    %c0_i32_0 = arith.constant 0 : i32
    %c0_i32_1 = arith.constant 0 : i32
    return %c0_i32, %c0_i32_0 : i32, i32
  }
  func.func @transform_3(%arg0: i32) -> (i32, i32) {
    %c0_i32 = arith.constant 0 : i32
    %c0_i32_0 = arith.constant 0 : i32
    return %arg0, %c0_i32 : i32, i32
  }
}

</mosaic_0001>

<bundles_post_ra>
// kernel: tpu_custom_call.1
= control target key start
LH: loop header
LB: loop body
LE: loop exit
PB: predicated region body
PF: predicated region fallthrough
CT: control target
= control target key end

     0   :  { %8 = vsyncpa [#allocation3], 0  ;;  %s263_s0 = inlined_call_operand.hbm [shape: f32[8,256], index: 0, kind: input, shape index: {}]   ;;  %s264_s1 = inlined_call_operand.hbm [shape: f32[256,128], index: 1, kind: input, shape index: {}]   ;;  %s265_s2 = inlined_call_operand.vmem [shape: f32[1,128], index: 2, kind: input, shape index: {}]   ;;  %s266_s3 = inlined_call_operand.hbm [shape: f32[8,128], index: 3, kind: output, shape index: {}]  }
   0x1   :  { %9 = vsyncpa [#allocation6], 0 }
   0x2   :  { %10 = vsyncpa [#allocation4], 0  ;;  %s16_s14 = sshll.u32 %s263_s0, 4  ;;  %s226_s15 = smov [#allocation2]   ;;  %s17_s14 = int_to_ptr.hbm [resolvable:$true] %s16_s14 }
   0x3   :  { %s18_s16 = sshll.u32 %s226_s15, 4  ;;  %s26_s19 = sshll.u32 %s264_s1, 4  ;;  %s19_s16 = int_to_ptr.vmem [resolvable:$true] %s18_s16  ;;  %s27_s19 = int_to_ptr.hbm [resolvable:$true] %s26_s19 }
   0x4   :  { %21 = dma.hbm_to_vmem [thread:$0]  %s17_s14, 256, %s19_s16, [#allocation3]  }
   0x5   :  { %s227_s20 = smov [#allocation5]   ;;  %s228_s22 = smov 128  }
   0x6   :  { %s28_s21 = sshll.u32 %s227_s20, 4  ;;  %s229_s23 = smov 8   ;;  %s29_s21 = int_to_ptr.vmem [resolvable:$true] %s28_s21 }
   0x7   :  { %34 = dma.hbm_to_vmem [thread:$0]  %s27_s19, 4096, %s29_s21, [#allocation6], %s228_s22, %s228_s22, %s229_s23  }
   0x8   :  { %220 = dma.done.wait [#allocation3], 256  }
   0x9   :  { %221 = vsyncadd [#allocation3], 4294967040 }
   0xa   :  { %222 = dma.done.wait [#allocation6], 4096  }
   0xb   :  { %223 = vsyncadd [#allocation6], 4294963200  ;;  %v62_v0 = vld [vmem:[#allocation5 + $0x78] sm:$0xff]  ;;  %v61_v1 = vld [vmem:[#allocation5 + $0x70] sm:$0xff]  ;;  %s230_s24 = smov [#allocation7]   ;;  %s131_s28 = sshll.u32 %s266_s3, 4  ;;  %s132_s28 = int_to_ptr.hbm [resolvable:$true] %s131_s28 }
   0xc   :  { %v78_v2 = vld [vmem:[#allocation5 + $0xf8] sm:$0xff]  ;;  %83 = vmatpush.msra.mxu0 %v62_v0  ;;  %v77_v3 = vld [vmem:[#allocation5 + $0xf0] sm:$0xff]  ;;  %v60_v4 = vld [vmem:[#allocation5 + $0x68] sm:$0xff]  ;;  %s129_s25 = sshll.u32 %s230_s24, 4  ;;  %s130_s25 = int_to_ptr.vmem [resolvable:$true] %s129_s25 }
   0xd   :  { %103 = vmatpush.msra.mxu1 %v78_v2  ;;  %v76_v5 = vld [vmem:[#allocation5 + $0xe8] sm:$0xff]  ;;  %v59_v6 = vld [vmem:[#allocation5 + $0x60] sm:$0xff]  ;;  %v58_v8 = vld [vmem:[#allocation5 + $0x58] sm:$0xff] }
   0xe   :  { %84 = vmatpush.msra.mxu0 %v61_v1  ;;  %v75_v7 = vld [vmem:[#allocation5 + $0xe0] sm:$0xff]  ;;  %v74_v9 = vld [vmem:[#allocation5 + $0xd8] sm:$0xff]  ;;  %v57_v10 = vld [vmem:[#allocation5 + $0x50] sm:$0xff] }
   0xf   :  { %104 = vmatpush.msra.mxu1 %v77_v3  ;;  %v73_v11 = vld [vmem:[#allocation5 + $0xd0] sm:$0xff]  ;;  %v56_v12 = vld [vmem:[#allocation5 + $0x48] sm:$0xff]  ;;  %v55_v14 = vld [vmem:[#allocation5 + $0x40] sm:$0xff] }
  0x10   :  { %85 = vmatpush.msra.mxu0 %v60_v4  ;;  %v72_v13 = vld [vmem:[#allocation5 + $0xc8] sm:$0xff]  ;;  %v71_v15 = vld [vmem:[#allocation5 + $0xc0] sm:$0xff]  ;;  %v54_v16 = vld [vmem:[#allocation5 + $0x38] sm:$0xff] }
  0x11   :  { %105 = vmatpush.msra.mxu1 %v76_v5  ;;  %v70_v17 = vld [vmem:[#allocation5 + $0xb8] sm:$0xff]  ;;  %v53_v18 = vld [vmem:[#allocation5 + $0x30] sm:$0xff]  ;;  %v52_v20 = vld [vmem:[#allocation5 + $0x28] sm:$0xff] }
  0x12   :  { %86 = vmatpush.msra.mxu0 %v59_v6  ;;  %v69_v19 = vld [vmem:[#allocation5 + $0xb0] sm:$0xff]  ;;  %v68_v21 = vld [vmem:[#allocation5 + $0xa8] sm:$0xff]  ;;  %v51_v22 = vld [vmem:[#allocation5 + $0x20] sm:$0xff] }
  0x13   :  { %106 = vmatpush.msra.mxu1 %v75_v7  ;;  %v67_v23 = vld [vmem:[#allocation5 + $0xa0] sm:$0xff]  ;;  %v50_v24 = vld [vmem:[#allocation5 + $0x18] sm:$0xff]  ;;  %v49_v26 = vld [vmem:[#allocation5 + $0x10] sm:$0xff] }
  0x14   :  { %87 = vmatpush.msra.mxu0 %v58_v8  ;;  %v66_v25 = vld [vmem:[#allocation5 + $0x98] sm:$0xff]  ;;  %v65_v27 = vld [vmem:[#allocation5 + $0x90] sm:$0xff]  ;;  %v48_v28 = vld [vmem:[#allocation5 + $0x8] sm:$0xff] }
  0x15   :  { %107 = vmatpush.msra.mxu1 %v74_v9  ;;  %v64_v29 = vld [vmem:[#allocation5 + $0x88] sm:$0xff]  ;;  %v47_v30 = vld [vmem:[#allocation5] sm:$0xff]  ;;  %v45_v32 = vld [vmem:[#allocation2] sm:$0xff] }
  0x16   :  { %88 = vmatpush.msra.mxu0 %v57_v10  ;;  %v63_v31 = vld [vmem:[#allocation5 + $0x80] sm:$0xff]  ;;  %v46_v33 = vld [vmem:[#allocation2 + $0x8] sm:$0xff]  ;;  %v147_v34 = vld [vmem:[%s265_s2] ss:$0 sm:$0xff] }
  0x17   :  { %108 = vmatpush.msra.mxu1 %v73_v11 }
  0x18   :  { %89 = vmatpush.msra.mxu0 %v56_v12 }
  0x19   :  { %109 = vmatpush.msra.mxu1 %v72_v13 }
  0x1a   :  { %90 = vmatpush.msra.mxu0 %v55_v14 }
  0x1b   :  { %110 = vmatpush.msra.mxu1 %v71_v15 }
  0x1c   :  { %91 = vmatpush.msra.mxu0 %v54_v16 }
  0x1d   :  { %111 = vmatpush.msra.mxu1 %v70_v17 }
  0x1e   :  { %92 = vmatpush.msra.mxu0 %v53_v18 }
  0x1f   :  { %112 = vmatpush.msra.mxu1 %v69_v19 }
  0x20   :  { %93 = vmatpush.msra.mxu0 %v52_v20 }
  0x21   :  { %113 = vmatpush.msra.mxu1 %v68_v21 }
  0x22   :  { %94 = vmatpush.msra.mxu0 %v51_v22 }
  0x23   :  { %114 = vmatpush.msra.mxu1 %v67_v23 }
  0x24   :  { %95 = vmatpush.msra.mxu0 %v50_v24 }
  0x25   :  { %115 = vmatpush.msra.mxu1 %v66_v25 }
  0x26   :  { %96 = vmatpush.msra.mxu0 %v49_v26 }
  0x27   :  { %116 = vmatpush.msra.mxu1 %v65_v27 }
  0x28   :  { %97 = vmatpush.msra.mxu0 %v48_v28 }
  0x29   :  { %117 = vmatpush.msra.mxu1 %v64_v29 }
  0x2a   :  { %98 = vmatpush.msra.mxu0 %v47_v30 }
  0x2b   :  { %118 = vmatpush.msra.mxu1 %v63_v31  ;;  %99 = vmatmul.f32.vlgmr.msra.gmra.mxu0 %v45_v32 }
  0x2c   :  { %119 = vmatmul.f32.vlgmr.msra.gmra.mxu1 %v46_v33 }
  0xa8   :  { %v100_v35 = vpop.f32.mrf.mxu0 }
  0xa9   :  { %v120_v36 = vpop.f32.mrf.mxu1  ;;  %v101_v37 = vadd.f32 %v147_v34, %v100_v35 }
  0xab   :  { %v121_v38 = vadd.f32 %v120_v36, %v101_v37 }
  0xad   :  { %123 = vst [vmem:[#allocation7] sm:$0xff] %v121_v38 }
  0xae   :  { %134 = dma.vmem_to_hbm [thread:$0]  %s130_s25, 128, %s132_s28, [#allocation4]  }
  0xaf   :  { %224 = dma.done.wait [#allocation4], 128  }
  0xb0   :  { %225 = vsyncadd [#allocation4], 4294967168 }
  0xb1   :  { %139 = vsyncpa [#allocation3], 1 }
  0xb2   :  { %140 = vsyncpa [#allocation6], 1 }
  0xb3   :  { %141 = vsyncpa [#allocation4], 1 }

</bundles_post_ra>
